<compile_context>
chip_gen: v5e
topology: v5e:2x2
jax: 0.10.0
libtpu: 0.0.40
codegen_flags: <defaults>
</compile_context>

<pallas_src>
import functools

import jax
import jax.numpy as jnp
from jax.experimental import pallas as pl
from jax.experimental.pallas import tpu as pltpu


# ----------------------------- VMEM sizing ---------------------------------
_VMEM_LIMIT_BYTES = 48 * 1024 * 1024   # safe on v5e/v6e (128 MiB) and v7x (64 MiB)
_SUM_BLOCK_BUDGET = 8 * 1024 * 1024    # pass 1 double-buffers only the x tile
_ADD_BLOCK_BUDGET = 6 * 1024 * 1024    # pass 2 double-buffers x tile + out tile
_FUSED_VMEM_BUDGET = 40 * 1024 * 1024  # 2*(x + out slab) + 2*weights must fit


def _pick_tile_t(C, T, itemsize, budget):
    """Pick a T-tile: full extent if it fits the budget, else the largest
    multiple of 128 that does (>=128).  Non-dividing tiles are allowed; the
    reduction kernel masks the tail and pass 2 relies on masked edge stores."""
    if T <= 128 or C * T * itemsize <= budget:
        return int(T)
    max_mult = (T // 128) * 128
    tile = (budget // (C * itemsize)) // 128 * 128
    return int(max(128, min(tile, max_mult)))


def _pick_tile_b(B, C, tile_t, itemsize, budget):
    """Largest divisor of B such that the whole (tile_b, C, tile_t) block fits."""
    best = 1
    for b in range(1, B + 1):
        if B % b == 0 and b * C * tile_t * itemsize <= budget:
            best = b
    return best


# ---------------------------------------------------------------------------
# Fused single-pass kernel: pool + excite + broadcast add for one batch element
# ---------------------------------------------------------------------------
def _fused_kernel(x_ref, w1_ref, b1_ref, w2_ref, b2_ref, o_ref, *, inv_t, mxu_reduce):
    x = x_ref[0]                                                   # (C, T), native dtype
    if mxu_reduce:
        # bf16: reduce on the otherwise-idle MXU (exact: multiplies by 1.0,
        # accumulates in f32) so the VPU cast+add / XLU reduce stay off the
        # critical slot at v7x bandwidth.
        ones = jnp.ones((x.shape[-1], 1), x.dtype)
        s = jnp.dot(x, ones, preferred_element_type=jnp.float32)   # (C, 1)
    else:
        s = jnp.sum(x.astype(jnp.float32), axis=-1, keepdims=True)  # (C, 1)
    s = s * inv_t                                                  # mean over T
    h = jnp.dot(w1_ref[...], s, preferred_element_type=jnp.float32) + b1_ref[...]
    h = jnp.maximum(h, 0.0)                                        # ReLU
    g = jnp.dot(w2_ref[...], h, preferred_element_type=jnp.float32) + b2_ref[...]
    gate = jax.nn.sigmoid(g).astype(o_ref.dtype)                   # (C, 1), native dtype
    o_ref[0] = x + gate                                            # broadcast over T


def _se_fused(x, w1, b1, w2, b2):
    B, C, T = x.shape
    C_red = w1.shape[0]
    itemsize = jnp.dtype(x.dtype).itemsize
    b1c = b1.reshape(C_red, 1)
    b2c = b2.reshape(C, 1)

    kernel = functools.partial(
        _fused_kernel,
        inv_t=1.0 / float(T),
        mxu_reduce=bool(x.dtype == jnp.bfloat16),
    )
    return pl.pallas_call(
        kernel,
        out_shape=jax.ShapeDtypeStruct((B, C, T), x.dtype),
        grid_spec=pltpu.PrefetchScalarGridSpec(
            num_scalar_prefetch=0,
            grid=(B,),
            in_specs=[
                pl.BlockSpec((1, C, T), lambda b: (b, 0, 0)),      # x slab
                pl.BlockSpec((C_red, C), lambda b: (0, 0)),        # w1
                pl.BlockSpec((C_red, 1), lambda b: (0, 0)),        # b1
                pl.BlockSpec((C, C_red), lambda b: (0, 0)),        # w2
                pl.BlockSpec((C, 1), lambda b: (0, 0)),            # b2
            ],
            out_specs=pl.BlockSpec((1, C, T), lambda b: (b, 0, 0)),
        ),
        compiler_params=pltpu.CompilerParams(
            dimension_semantics=("parallel",),
            vmem_limit_bytes=_VMEM_LIMIT_BYTES,
        ),
        cost_estimate=pl.CostEstimate(
            flops=2 * B * C * T + 4 * B * C * C_red,
            transcendentals=B * C,
            bytes_accessed=2 * B * C * T * itemsize,
        ),
    )(x, w1, b1c, w2, b2c)


# ---------------------------------------------------------------------------
# Two-pass path.  Pass 1: pooled sums over T (masked edge tile, optional T-split
# for B == 1).  Excite: batched over B in XLA.  Pass 2: broadcast add.
# ---------------------------------------------------------------------------
def _sum_kernel(x_ref, sums_ref, acc_ref, *, total_t, tile_t, tiles_per_split,
                mxu_reduce):
    s_idx = pl.program_id(1)
    t_idx = pl.program_id(2)

    @pl.when(t_idx == 0)
    def _():
        acc_ref[...] = jnp.zeros_like(acc_ref)

    x = x_ref[0]                                                   # (C, tile_t)
    if total_t % tile_t != 0:
        # Mask the out-of-range tail columns of the ragged edge block so the
        # running sum never sees the garbage Pallas pads edge blocks with.
        start = (s_idx * tiles_per_split + t_idx) * tile_t
        col = jax.lax.broadcasted_iota(jnp.int32, x.shape, 1)
        x = jnp.where(col < (total_t - start), x, jnp.zeros_like(x))

    if mxu_reduce:
        ones = jnp.ones((tile_t, 1), x.dtype)
        acc_ref[...] += jnp.dot(x, ones, preferred_element_type=jnp.float32)
    else:
        acc_ref[...] += jnp.sum(x.astype(jnp.float32), axis=-1, keepdims=True)

    @pl.when(t_idx == pl.num_programs(2) - 1)
    def _():
        sums_ref[0, 0] = acc_ref[...]


def _add_kernel(x_ref, gate_ref, o_ref):
    # x_ref/o_ref: (tile_b, C, tile_t); gate_ref: (tile_b, C, 1), already in
    # the native dtype -> pure load-add-store at the HBM roofline.
    o_ref[...] = x_ref[...] + gate_ref[...]


def _se_two_pass(x, w1, b1, w2, b2, *, sum_tile_t=None, add_tile_t=None,
                 add_tile_b=None):
    B, C, T = x.shape
    C_red = w1.shape[0]
    itemsize = jnp.dtype(x.dtype).itemsize

    # ---- Pass 1: pooled f32 sums, shape (B, n_split, C, 1) -------------------
    tile_t1 = sum_tile_t if sum_tile_t is not None else _pick_tile_t(
        C, T, itemsize, _SUM_BLOCK_BUDGET)
    grid_t = int(pl.cdiv(T, tile_t1))
    # v7x has two TensorCores; with B == 1 a (B, T)-grid reduction would leave
    # one core idle, so split T into two parallel partial sums instead.
    n_split = 2 if (B == 1 and grid_t >= 2 and grid_t % 2 == 0) else 1
    tiles_per_split = grid_t // n_split

    sum_kernel = functools.partial(
        _sum_kernel,
        total_t=T, tile_t=tile_t1, tiles_per_split=tiles_per_split,
        mxu_reduce=bool(x.dtype == jnp.bfloat16),
    )
    sums = pl.pallas_call(
        sum_kernel,
        out_shape=jax.ShapeDtypeStruct((B, n_split, C, 1), jnp.float32),
        grid_spec=pltpu.PrefetchScalarGridSpec(
            num_scalar_prefetch=0,
            grid=(B, n_split, tiles_per_split),
            in_specs=[pl.BlockSpec(
                (1, C, tile_t1),
                lambda b, s, t: (b, 0, s * tiles_per_split + t))],
            out_specs=pl.BlockSpec((1, 1, C, 1), lambda b, s, t: (b, s, 0, 0)),
            scratch_shapes=[pltpu.VMEM((C, 1), jnp.float32)],
        ),
        compiler_params=pltpu.CompilerParams(
            dimension_semantics=("parallel", "parallel", "arbitrary"),
            vmem_limit_bytes=_VMEM_LIMIT_BYTES,
        ),
        cost_estimate=pl.CostEstimate(
            flops=B * C * T,
            transcendentals=0,
            bytes_accessed=B * C * T * itemsize + B * n_split * C * 4,
        ),
    )(x)

    # ---- Excite: batched over B in plain XLA (one MXU-friendly matmul with
    #      M=B instead of B serialized lane-width-1 matvecs inside the grid) ---
    s = sums.sum(axis=1) * (1.0 / float(T))                         # (B, C, 1) f32
    h = jnp.einsum("rc,bco->bro", w1, s) + b1[None, :, None]        # (B, C_red, 1)
    h = jnp.maximum(h, 0.0)
    g = jnp.einsum("cr,bro->bco", w2, h) + b2[None, :, None]        # (B, C, 1)
    gate = jax.nn.sigmoid(g).astype(x.dtype)                        # native dtype

    # ---- Pass 2: broadcast add, tiled over (B, T), native dtype --------------
    tile_t2 = add_tile_t if add_tile_t is not None else _pick_tile_t(
        C, T, itemsize, _ADD_BLOCK_BUDGET)
    tile_b = add_tile_b if add_tile_b is not None else _pick_tile_b(
        B, C, tile_t2, itemsize, _ADD_BLOCK_BUDGET)
    grid_b = B // tile_b
    grid_t2 = int(pl.cdiv(T, tile_t2))

    out = pl.pallas_call(
        _add_kernel,
        out_shape=jax.ShapeDtypeStruct((B, C, T), x.dtype),
        grid_spec=pltpu.PrefetchScalarGridSpec(
            num_scalar_prefetch=0,
            grid=(grid_b, grid_t2),
            in_specs=[
                pl.BlockSpec((tile_b, C, tile_t2), lambda b, t: (b, 0, t)),  # x
                pl.BlockSpec((tile_b, C, 1), lambda b, t: (b, 0, 0)),        # gate
            ],
            out_specs=pl.BlockSpec((tile_b, C, tile_t2), lambda b, t: (b, 0, t)),
        ),
        compiler_params=pltpu.CompilerParams(
            dimension_semantics=("parallel", "parallel"),
            vmem_limit_bytes=_VMEM_LIMIT_BYTES,
        ),
        cost_estimate=pl.CostEstimate(
            flops=B * C * T,
            transcendentals=0,
            bytes_accessed=2 * B * C * T * itemsize + B * C * itemsize,
        ),
    )(x, gate)
    return out


# ---------------------------------------------------------------------------
# Public entry point
# ---------------------------------------------------------------------------
def se_module(x, w1, b1, w2, b2, *, fused=None, sum_tile_t=None,
              add_tile_t=None, add_tile_b=None):
    """SEModule forward: x + sigmoid(conv2(relu(conv1(adaptive_avg_pool1d(x, 1))))).

    x:  (B, C, T)    batch, channels, time (PyTorch Conv1d NCT layout)
    w1: (C_red, C)   conv1 weight (kernel_size=1, squeezed), b1: (C_red,)
    w2: (C, C_red)   conv2 weight (kernel_size=1, squeezed), b2: (C,)
    fused / *_tile_*: optional overrides (None = auto-dispatch / auto-tile).
    """
    B, C, T = x.shape
    itemsize = jnp.dtype(x.dtype).itemsize
    if fused is None:
        w_itemsize = jnp.dtype(w1.dtype).itemsize
        weight_bytes = (w1.size + w2.size + b1.size + b2.size) * w_itemsize
        slab = C * T * itemsize  # one (1, C, T) block
        # Fused path keeps the x block + out block double-buffered plus the
        # double-buffered weights resident; require it to fit comfortably
        # under the 48 MiB scoped-VMEM limit (v7x has only 64 MiB physical).
        fused = (4 * slab + 2 * weight_bytes) <= _FUSED_VMEM_BUDGET
    if fused:
        return _se_fused(x, w1, b1, w2, b2)
    return _se_two_pass(x, w1, b1, w2, b2, sum_tile_t=sum_tile_t,
                        add_tile_t=add_tile_t, add_tile_b=add_tile_b)


def _reference(x, w1, b1, w2, b2):
    # Pure-JAX (f32) reference mirroring the PyTorch forward.
    xf = x.astype(jnp.float32)
    s = jnp.mean(xf, axis=-1, keepdims=True)                       # (B, C, 1)
    h = jnp.einsum("rc,bco->bro", w1.astype(jnp.float32), s) + b1[None, :, None]
    h = jnp.maximum(h, 0.0)
    s2 = jnp.einsum("cr,bro->bco", w2.astype(jnp.float32), h) + b2[None, :, None]
    return xf + jax.nn.sigmoid(s2)


if __name__ == "__main__":
    def run_case(name, B, C, T, dtype, tol, **kw):
        reduction = 4
        C_red = max(1, C // reduction)
        key = jax.random.PRNGKey(0)
        kx, k1, k2, k3, k4 = jax.random.split(key, 5)
        x = jax.random.normal(kx, (B, C, T), dtype=jnp.float32).astype(dtype)
        # Conv1d kernel_size=1 weights squeezed from (out, in, 1) to (out, in).
        w1 = jax.random.normal(k1, (C_red, C), dtype=jnp.float32) * 0.1
        b1 = jax.random.normal(k2, (C_red,), dtype=jnp.float32) * 0.1
        w2 = jax.random.normal(k3, (C, C_red), dtype=jnp.float32) * 0.1
        b2 = jax.random.normal(k4, (C,), dtype=jnp.float32) * 0.1

        out = jax.block_until_ready(se_module(x, w1, b1, w2, b2, **kw))
        ref = _reference(x, w1, b1, w2, b2)
        assert out.shape == (B, C, T), name
        assert out.dtype == x.dtype, name
        assert jnp.allclose(out.astype(jnp.float32), ref, atol=tol, rtol=tol), \
            f"mismatch vs reference in case {name}"

    # Fused single-pass path (per-batch slab fits VMEM).
    run_case("fused_f32", 2, 16, 32, jnp.float32, 1e-5)
    # Two-pass path, multi-tile reduction with a masked tail (T % 128 != 0).
    run_case("two_pass_masked_f32", 2, 16, 200, jnp.float32, 1e-5,
             fused=False, sum_tile_t=128, add_tile_t=128)
    # Two-pass path, B == 1: pass 1 splits T into two parallel partial sums.
    run_case("two_pass_b1_split_f32", 1, 16, 512, jnp.float32, 1e-5,
             fused=False, sum_tile_t=128, add_tile_t=128)
    # bf16 activations exercise the MXU pooling reduce and the native-dtype gate.
    run_case("fused_bf16", 2, 16, 64, jnp.bfloat16, 5e-2)
    run_case("two_pass_bf16", 2, 16, 256, jnp.bfloat16, 5e-2,
             fused=False, sum_tile_t=128, add_tile_t=128)

    print("KERNEL_OK")
</pallas_src>

<mosaic_0001>
module attributes {stable_mosaic.version = 11 : i64} {
  func.func @_fused_kernel(%arg0: i32, %arg1: memref<1x16x32xf32, #tpu.memory_space<vmem>>, %arg2: memref<4x16xf32, #tpu.memory_space<vmem>>, %arg3: memref<4x1xf32, #tpu.memory_space<vmem>>, %arg4: memref<16x4xf32, #tpu.memory_space<vmem>>, %arg5: memref<16x1xf32, #tpu.memory_space<vmem>>, %arg6: memref<1x16x32xf32, #tpu.memory_space<vmem>>) attributes {dimension_semantics = [#tpu.dimension_semantics<parallel>], iteration_bounds = array<i64: 2>, scalar_prefetch = 0 : i64, scratch_operands = 0 : i64, tpu.core_type = #tpu.core_type<tc>, window_params = [{transform_indices = @transform_0, window_bounds = array<i64: 1, 16, 32>}, {pipeline_mode = #tpu.pipeline_mode<synchronous>, transform_indices = @transform_1, window_bounds = array<i64: 4, 16>}, {pipeline_mode = #tpu.pipeline_mode<synchronous>, transform_indices = @transform_2, window_bounds = array<i64: 4, 1>}, {pipeline_mode = #tpu.pipeline_mode<synchronous>, transform_indices = @transform_3, window_bounds = array<i64: 16, 4>}, {pipeline_mode = #tpu.pipeline_mode<synchronous>, transform_indices = @transform_4, window_bounds = array<i64: 16, 1>}, {transform_indices = @transform_5, window_bounds = array<i64: 1, 16, 32>}]} {
    %c0 = arith.constant 0 : index
    %c0_0 = arith.constant 0 : index
    %c0_1 = arith.constant 0 : index
    %0 = vector.load %arg1[%c0, %c0_0, %c0_1] : memref<1x16x32xf32, #tpu.memory_space<vmem>>, vector<1x16x32xf32>
    %1 = vector.shape_cast %0 : vector<1x16x32xf32> to vector<16x32xf32>
    %cst = arith.constant dense<0.000000e+00> : vector<16xf32>
    %2 = vector.multi_reduction <add>, %1, %cst [1] : vector<16x32xf32> to vector<16xf32>
    %3 = vector.shape_cast %2 : vector<16xf32> to vector<16x1xf32>
    %cst_2 = arith.constant 3.125000e-02 : f32
    %4 = vector.broadcast %cst_2 : f32 to vector<16x1xf32>
    %5 = arith.mulf %3, %4 : vector<16x1xf32>
    %c0_3 = arith.constant 0 : index
    %c0_4 = arith.constant 0 : index
    %6 = vector.load %arg2[%c0_3, %c0_4] : memref<4x16xf32, #tpu.memory_space<vmem>>, vector<4x16xf32>
    %cst_5 = arith.constant dense<0.000000e+00> : vector<4x1xf32>
    %7 = tpu.matmul %6, %5, %cst_5 {dimension_numbers = #tpu.dot_dimension_numbers<[1], [0], [0], [1], [0, 0, 1, 1], [], []>} : vector<4x16xf32>, vector<16x1xf32>, vector<4x1xf32> -> vector<4x1xf32>
    %c0_6 = arith.constant 0 : index
    %c0_7 = arith.constant 0 : index
    %8 = vector.load %arg3[%c0_6, %c0_7] : memref<4x1xf32, #tpu.memory_space<vmem>>, vector<4x1xf32>
    %9 = arith.addf %7, %8 : vector<4x1xf32>
    %cst_8 = arith.constant 0.000000e+00 : f32
    %10 = vector.broadcast %cst_8 : f32 to vector<4x1xf32>
    %11 = arith.maximumf %9, %10 : vector<4x1xf32>
    %c0_9 = arith.constant 0 : index
    %c0_10 = arith.constant 0 : index
    %12 = vector.load %arg4[%c0_9, %c0_10] : memref<16x4xf32, #tpu.memory_space<vmem>>, vector<16x4xf32>
    %cst_11 = arith.constant dense<0.000000e+00> : vector<16x1xf32>
    %13 = tpu.matmul %12, %11, %cst_11 {dimension_numbers = #tpu.dot_dimension_numbers<[1], [0], [0], [1], [0, 0, 1, 1], [], []>} : vector<16x4xf32>, vector<4x1xf32>, vector<16x1xf32> -> vector<16x1xf32>
    %c0_12 = arith.constant 0 : index
    %c0_13 = arith.constant 0 : index
    %14 = vector.load %arg5[%c0_12, %c0_13] : memref<16x1xf32, #tpu.memory_space<vmem>>, vector<16x1xf32>
    %15 = arith.addf %13, %14 : vector<16x1xf32>
    %16 = arith.negf %15 : vector<16x1xf32>
    %17 = math.exp %16 : vector<16x1xf32>
    %cst_14 = arith.constant 1.000000e+00 : f32
    %18 = vector.broadcast %cst_14 : f32 to vector<16x1xf32>
    %19 = arith.addf %18, %17 : vector<16x1xf32>
    %20 = arith.divf %18, %19 : vector<16x1xf32>
    %21 = vector.broadcast %20 : vector<16x1xf32> to vector<16x32xf32>
    %22 = arith.addf %1, %21 : vector<16x32xf32>
    %c0_15 = arith.constant 0 : index
    %c0_16 = arith.constant 0 : index
    %c0_17 = arith.constant 0 : index
    %23 = vector.load %arg6[%c0_15, %c0_16, %c0_17] : memref<1x16x32xf32, #tpu.memory_space<vmem>>, vector<1x16x32xf32>
    %24 = vector.shape_cast %23 : vector<1x16x32xf32> to vector<16x32xf32>
    %25 = vector.shape_cast %22 : vector<16x32xf32> to vector<1x16x32xf32>
    tpu.vector_store %arg6[%c0_15, %c0_16, %c0_17], %25 {strides = array<i32>} : memref<1x16x32xf32, #tpu.memory_space<vmem>>, vector<1x16x32xf32>,
    return
  }
  func.func @transform_0(%arg0: i32) -> (i32, i32, i32) {
    %c0_i32 = arith.constant 0 : i32
    %c0_i32_0 = arith.constant 0 : i32
    %c0_i32_1 = arith.constant 0 : i32
    return %arg0, %c0_i32, %c0_i32_0 : i32, i32, i32
  }
  func.func @transform_1(%arg0: i32) -> (i32, i32) {
    %c0_i32 = arith.constant 0 : i32
    %c0_i32_0 = arith.constant 0 : i32
    %c0_i32_1 = arith.constant 0 : i32
    return %c0_i32, %c0_i32_0 : i32, i32
  }
  func.func @transform_2(%arg0: i32) -> (i32, i32) {
    %c0_i32 = arith.constant 0 : i32
    %c0_i32_0 = arith.constant 0 : i32
    %c0_i32_1 = arith.constant 0 : i32
    return %c0_i32, %c0_i32_0 : i32, i32
  }
  func.func @transform_3(%arg0: i32) -> (i32, i32) {
    %c0_i32 = arith.constant 0 : i32
    %c0_i32_0 = arith.constant 0 : i32
    %c0_i32_1 = arith.constant 0 : i32
    return %c0_i32, %c0_i32_0 : i32, i32
  }
  func.func @transform_4(%arg0: i32) -> (i32, i32) {
    %c0_i32 = arith.constant 0 : i32
    %c0_i32_0 = arith.constant 0 : i32
    %c0_i32_1 = arith.constant 0 : i32
    return %c0_i32, %c0_i32_0 : i32, i32
  }
  func.func @transform_5(%arg0: i32) -> (i32, i32, i32) {
    %c0_i32 = arith.constant 0 : i32
    %c0_i32_0 = arith.constant 0 : i32
    %c0_i32_1 = arith.constant 0 : i32
    return %arg0, %c0_i32, %c0_i32_0 : i32, i32, i32
  }
}

</mosaic_0001>

<bundles_post_ra>
// kernel: tpu_custom_call.1
= control target key start
LH: loop header
LB: loop body
LE: loop exit
PB: predicated region body
PF: predicated region fallthrough
CT: control target
= control target key end

     0   :  { %10 = vsyncpa [#allocation3], 0  ;;  %s714_s0 = inlined_call_operand.vmem [shape: f32[2,16,32], index: 0, kind: input, shape index: {}]   ;;  %s715_s1 = inlined_call_operand.vmem [shape: f32[4,16], index: 1, kind: input, shape index: {}]   ;;  %s716_s2 = inlined_call_operand.vmem [shape: f32[4,1], index: 2, kind: input, shape index: {}]   ;;  %s717_s3 = inlined_call_operand.vmem [shape: f32[16,4], index: 3, kind: input, shape index: {}]   ;;  %s718_s4 = inlined_call_operand.vmem [shape: f32[16,1], index: 4, kind: input, shape index: {}]   ;;  %s719_s5 = inlined_call_operand.hbm [shape: f32[2,16,32], index: 5, kind: output, shape index: {}]  }
   0x1   :  { %12 = vsyncpa [#allocation3 + $0x1], 0  ;;  %s599_s18 = smov 0   ;;  %s601_s19 = smov 0  }
   0x2   :  { %s603_s20 = smov 0   ;;  %s605_s21 = smov 0  }
   0x3 LB: > { %s620_s22 = sadd.s32 4294967295, %s564_s21   ;;  %s429_s23 = sadd.s32 4294967294, %s564_s21   ;;  %s564_s21 = sphi %s605_s21, %s725_s21   ;;  %s560_s20 = sphi %s603_s20, %s724_s20   ;;  %s556_s19 = sphi %s601_s19, %s723_s19   ;;  %s552_s18 = sphi %s599_s18, %s722_s18  }
   0x4   : > { %s624_s24 = sadd.s32 1, %s564_s21   ;;  %s135_s25 = sadd.s32 1, %s560_s20 }
   0x5   : > { %s132_s26 = ssub.s32 %s564_s21, %s624_s24  ;;  %p145_p0 = scmp.ne.s32.totalorder %s560_s20, %s556_s19 }
   0x6   : > { %p133_p1 = scmp.eq.s32.totalorder %s132_s26, 0  ;;  %p146_p2 = scmp.eq.s32.totalorder %s620_s22, 1 }
   0x7   : > { %p151_p3 = scmp.ne.s32.totalorder %s556_s19, %s552_s18  ;;  %p152_p4 = scmp.eq.s32.totalorder %s429_s23, 1 }
   0x8   : > { %s635_s27 = scalar_select %p133_p1, %s560_s20, %s135_s25  }
   0x9   : > { %p637_p5 = por %p146_p2, %p145_p0  ;;  %p641_p6 = por %p152_p4, %p151_p3 }
   0xa   : > { %p432_p7 = scmp.ge.s32.totalorder %s564_s21, 1  ;;  %p190_p8 = scmp.lt.s32.totalorder %s564_s21, 3 }
   0xc   : > { %p191_p9 = pnand %p432_p7, %p190_p8 }
   0xd   : > { %p218_p10 = scmp.lt.s32.totalorder (!%p191_p9), %s620_s22, 1  ;;  %s448_s8 = sshll.u32 (!%p191_p9), %s620_s22, 4 }
   0xe   : > { %194 = sbr.rel (%p191_p9) target bundleno = 568 (0x238), region = 40  ;;  %s363_s11 = scalar_lea.hbm (!%p191_p9), %s719_s5, %s448_s8 }
   0xf   : > { %s366_s14 = sshll.u32 (!%p191_p9), %s363_s11, 4  ;;  %s522_s25 = scalar_lea.hbm (!%p191_p9), %s719_s5, 32  ;;  %s367_s14 = int_to_ptr.hbm [resolvable:$true] %s366_s14 }
  0x10   : > { %s516_s15 = sshra.s32 (!%p191_p9), %s367_s14, 4  ;;  %s517_s15 = int_to_ptr.hbm [resolvable:$true] %s516_s15 }
  0x11   : > { %s518_s16 = scalar_lea.hbm (!%p191_p9), %s517_s15, 16  ;;  %p523_p0 = scmp.lt.s32.totalorder (!%p191_p9), %s517_s15, %s719_s5 }
  0x12   : > { %p519_p11 = scmp.ne.s32.totalorder (!%p191_p9), %s517_s15, %s518_s16  ;;  %p524_p1 = scmp.lt.s32.totalorder (!%p191_p9), %s522_s25, %s518_s16 }
  0x13   : > { %s219_s30 = scalar_select %p218_p10, %s620_s22, 1  ;;  %vm225_vm0 = vcmask 261120   ;;  %v234_v8 = vld [vmem:[%s715_s1] sm:$0xf]  ;;  %vm236_vm1 = vcmask 130048   ;;  %vm272_vm2 = vcmask 1043456  }
  0x14   : > { %v235_v9 = vld [vmem:[%s716_s2] sm:$0xf]  ;;  %vm265_vm3 = vcmask 31744   ;;  %v262_v14 = vld [vmem:[%s717_s3 + $0x8] sm:$0xff]  ;;  %v566_v15 = vmov 0   ;;  %p520_p12 = pnand %p519_p11, %p637_p5  ;;  %p525_p2 = por %p524_p1, %p523_p0 }
  0x15   : > { %s447_s6 = sshll.u32 %s219_s30, 4  ;;  %v261_v13 = vld [vmem:[%s717_s3] sm:$0xff]  ;;  %492 = vset.pattern.permute.xlu1 %v566_v15  ;;  %493 = vset.pattern.permute.xlu0 %v566_v15  ;;  %v264_v20 = vld [vmem:[%s718_s4 + $0x8] sm:$0xff] }
  0x16   : > { %s222_s9 = scalar_lea.vmem %s714_s0, %s447_s6  ;;  %v263_v16 = vld [vmem:[%s718_s4] sm:$0xff]  ;;  %s215_s6 = sand.u32 1, %s556_s19  }
  0x17   : > { %v652_v0 = vld [vmem:[%s222_s9 + $0x8] sm:$0xff]  ;;  %v656_v2 = vld [vmem:[%s222_s9] sm:$0xff]  ;;  %s433_s7 = sshll.u32 %s215_s6, 4  ;;  %s352_s22 = scalar_lea.sflag [#allocation3], %s215_s6 }
  0x18   : > { %v229_v1 = vsel %vm225_vm0, %v652_v0, 0.0  ;;  %v226_v3 = vsel %vm225_vm0, %v656_v2, 0.0  ;;  %s217_s12 = scalar_lea.vmem [#allocation2], %s433_s7  ;;  %p521_p13 = pneg %p520_p12 }
  0x19   : > { %230 = vadd.xlane.f32.xlu0 %v229_v1  ;;  %s364_s13 = sshll.u32 %s217_s12, 4  ;;  %s365_s13 = int_to_ptr.vmem [resolvable:$true] %s364_s13 }
  0x1a   : > { %p526_p3 = pnand %p525_p2, %p521_p13 }
  0x21   : > { %227 = vadd.xlane.f32.xlu0 %v226_v3 }
  0x8c   : > { %v231_v4 = vpop.xlane.xlu0 %230 }
  0x8d   : > { %v233_v5 = vmul.f32 0.03125, %v231_v4 }
  0x8f   : > { %254 = vmatpush.msra.mxu0 %v233_v5 }
  0x94   : > { %v228_v6 = vpop.xlane.xlu0 %227 }
  0x95   : > { %v232_v7 = vmul.f32 0.03125, %v228_v6 }
  0x97   : > { %255 = vmatpush.msra.mxu0 %v232_v7 }
  0x98   : > { %436 = vmatmul.msk.f32.vlgmr.msra.gmra.mxu0 %vm236_vm1, %v234_v8 }
 0x115   : > { %v257_v10 = vpop.f32.mrf.mxu0 }
 0x116   : > { %v258_v11 = vadd.f32 %v257_v10, %v235_v9 }
 0x118   : > { %v260_v12 = vmax.f32 %v258_v11, 0.0 }
 0x11a   : > { %437 = vmatpush.msk.msra.mxu1 %vm272_vm2, %v260_v12  ;;  %449 = vmatpush.msk.msra.mxu2 %vm272_vm2, %v260_v12 }
 0x11b   : > { %438 = vmatmul.msk.f32.vlgmr.msra.gmra.mxu1 %vm265_vm3, %v261_v13  ;;  %439 = vmatmul.msk.f32.vlgmr.msra.gmra.mxu2 %vm265_vm3, %v262_v14 }
 0x198   : > { %v293_v17 = vpop.f32.mrf.mxu1 }
 0x199   : > { %v294_v18 = vadd.f32 %v293_v17, %v263_v16 }
 0x19b   : > { %v440_v19 = vmul.f32 -1.442695, %v294_v18 }
 0x19d   : > { %494 = vpow2.f32 %v440_v19 }
 0x19e   : > { %v296_v21 = vpop.f32.mrf.mxu2 }
 0x19f   : > { %v297_v22 = vadd.f32 %v296_v21, %v264_v20 }
 0x1a1   : > { %v441_v23 = vmul.f32 -1.442695, %v297_v22 }
 0x1a3   : > { %v495_v24 = vpop.eup %494  ;;  %496 = vpow2.f32 %v441_v23 }
 0x1a4   : > { %v305_v25 = vadd.f32 1.0, %v495_v24 }
 0x1a6   : > { %498 = vrcp.f32 %v305_v25  ;;  %v318_v31 = vand.u32 2147483648, %v305_v25  ;;  %v316_v33 = vand.u32 2147483647, %v305_v25  ;;  %vm312_vm5 = vweird.f32 %v305_v25 }
 0x1a8   : > { %v319_v37 = vor.u32 1.1754944e-38, %v318_v31  ;;  %vm317_vm7 = vcmp.eq.f32.partialorder %v316_v33, 8.507059e+37 }
 0x1a9   : > { %v497_v26 = vpop.eup %496 }
 0x1aa   : > { %v306_v27 = vadd.f32 1.0, %v497_v26 }
 0x1ac   : > { %v499_v28 = vpop.eup %498  ;;  %500 = vrcp.f32 %v306_v27  ;;  %v333_v42 = vand.u32 2147483648, %v306_v27  ;;  %vm327_vm9 = vweird.f32 %v306_v27  ;;  %v331_v44 = vand.u32 2147483647, %v306_v27 }
 0x1ad   : > { %v308_v29 = vmul.f32 %v499_v28, %v305_v25  ;;  %vm313_vm4 = vweird.f32 %v499_v28 }
 0x1ae   : > { %vm314_vm6 = vmor %vm312_vm5, %vm313_vm4  ;;  %v334_v46 = vor.u32 1.1754944e-38, %v333_v42  ;;  %vm332_vm11 = vcmp.eq.f32.partialorder %v331_v44, 8.507059e+37 }
 0x1af   : > { %v309_v30 = vsub.f32 1.0, %v308_v29 }
 0x1b1   : > { %v310_v32 = vmul.f32 %v499_v28, %v309_v30 }
 0x1b2   : > { %v501_v34 = vpop.eup %500 }
 0x1b3   : > { %v311_v35 = vadd.f32 %v499_v28, %v310_v32  ;;  %v323_v36 = vmul.f32 %v501_v34, %v306_v27  ;;  %vm328_vm8 = vweird.f32 %v501_v34 }
 0x1b4   : > { %vm329_vm10 = vmor %vm327_vm9, %vm328_vm8 }
 0x1b5   : > { %v315_v38 = vsel %vm314_vm6, %v499_v28, %v311_v35  ;;  %v324_v39 = vsub.f32 1.0, %v323_v36 }
 0x1b6   : > { %v320_v40 = vsel %vm317_vm7, %v319_v37, %v315_v38 }
 0x1b7   : > { %339 = vperm.xlu1 %492, %v320_v40   ;;  %v325_v41 = vmul.f32 %v501_v34, %v324_v39 }
 0x1b9   : > { %v326_v43 = vadd.f32 %v501_v34, %v325_v41 }
 0x1bb   : > { %v330_v45 = vsel %vm329_vm10, %v501_v34, %v326_v43 }
 0x1bc   : > { %v335_v47 = vsel %vm332_vm11, %v334_v46, %v330_v45 }
 0x1bf   : > { %344 = vperm.xlu1 %492, %v335_v47  }
 0x229   : > { %v340_v48 = vpop.permute.xlu1 %339 }
 0x22a   : > { %v347_v49 = vadd.f32 %v340_v48, %v656_v2 }
 0x22c   : > { %349 = vst.msk [vmem:[%s217_s12] sm:$0xff] %vm225_vm0, %v347_v49 }
 0x231   : > { %v345_v50 = vpop.permute.xlu1 %344 }
 0x232   : > { %v348_v51 = vadd.f32 %v345_v50, %v652_v0 }
 0x234   : > { %350 = vst.msk [vmem:[%s217_s12 + $0x8] sm:$0xff] %vm225_vm0, %v348_v51 }
 0x235   : > { %529 = shalt.err (!%p526_p3)
}
 0x236   : > { %s567_s6 = smov 128   ;;  %s568_s7 = smov 8  }
 0x237   : > { %450 = dma.vmem_to_hbm [thread:$0]  (%p637_p5), %s365_s13, 256, %s367_s14, %s352_s22, %s567_s6, %s567_s6, %s568_s7  }
 0x238 PF: > { %p456_p4 = scmp.ge.s32.totalorder %s564_s21, 2  ;;  %s381_s8 = sand.u32 1, %s552_s18  }
 0x239   : > { %s382_s9 = scalar_lea.sflag [#allocation3], %s381_s8 }
 0x23a   : > { %p453_p7 = pnand %p456_p4, %p641_p6 }
 0x23c   : > { %p454_p8 = pneg %p453_p7 }
 0x23e   : > { %547 = dma.done.wait (%p454_p8), %s382_s9, 256  }
 0x23f   : > { %549 = vsyncadd (%p454_p8), %s382_s9, 4294967040  ;;  %p15_p9 = scmp.ge.s32.totalorder %s624_s24, 4   ;;  %s722_s18 = smov %s556_s19 }
 0x240   : > { %s723_s19 = smov %s560_s20  ;;  %s724_s20 = smov %s635_s27 }
 0x241   : > { %s725_s21 = smov %s624_s24  ;;  %17 = sbr.rel (!%p15_p9) target bundleno = 3 (0x3), region = 75 }
 0x246   :  { %388 = vsyncpa [#allocation3], 1 }
 0x247   :  { %390 = vsyncpa [#allocation3 + $0x1], 1 }

</bundles_post_ra>
